<compile_context>
chip_gen: v5e
topology: v5e:2x2
jax: 0.10.0
libtpu: 0.0.40
codegen_flags: <defaults>
</compile_context>

<pallas_src>
import math

import jax
import jax.numpy as jnp
from jax.experimental import pallas as pl
from jax.experimental.pallas import tpu as pltpu

_MiB = 1024 * 1024


def _repeat_kernel(x_ref, o_ref):
    # x_ref: (1, 1, row_len) lane-dense input slab (resident across q chunks).
    # o_ref: (1, q_chunk, row_len) output slab — one sublane broadcast + full,
    # unmasked vector stores (row_len is kept 128-lane dense by the wrapper).
    o_ref[...] = jnp.broadcast_to(x_ref[...], o_ref.shape)


def _sublane_multiple(dtype) -> int:
    # Native (sublane, lane) tiling: (8,128) for 4-byte, (16,128) for 2-byte,
    # (32,128) for 1-byte dtypes. The q-chunk must respect this (or equal the
    # full array dim) to stay lowerable without padding.
    return {4: 8, 2: 16, 1: 32}.get(jnp.dtype(dtype).itemsize, 8)


def _vmem_block_budget_bytes() -> int:
    # Per-output-block byte budget keyed off the chip's VMEM:
    #   v7x  (64 MiB VMEM)  ->  8 MiB blocks
    #   v5e/v6e (128 MiB)   -> 12 MiB blocks (capped)
    # Fallback: 8 MiB. Double-buffered output (2x) + the tiny input slab stays
    # comfortably under the 32 MiB vmem_limit_bytes requested below.
    try:
        cap = getattr(pltpu.get_tpu_info(), "vmem_capacity_bytes", None)
    except Exception:
        cap = None
    if not cap:
        return 8 * _MiB
    return max(4 * _MiB, min(12 * _MiB, cap // 8))


def _chip_has_multiple_tensorcores() -> bool:
    # Megacore gate: only force >=2 grid points on chips whose TensorCores are
    # sharded via "parallel" grid axes. v5e/v6e are single-TC, so the extra
    # q-split (one more pipeline prologue/epilogue) is skipped there.
    try:
        kind = jax.devices()[0].device_kind.lower()
    except Exception:
        return True  # conservative: allow the split
    single_tc = any(
        tag in kind
        for tag in ("v5e", "v5 lite", "v5lite", "v6e", "v6 lite", "v6lite")
    )
    return not single_tc


def _pick_row_chunk(n_rows: int, row_bytes: int, sublane_mult: int,
                    budget_bytes: int, force_two_chunks: bool) -> int:
    """Largest sublane-aligned row chunk under the byte budget.

    Divisor-free: the q-grid uses pl.cdiv, so the final block may be partial
    (Pallas masks its writeback). If `force_two_chunks`, split the q axis so
    both TensorCores of a megacore chip get work even when B == 1.
    """
    by_budget = max(1, budget_bytes // max(row_bytes, 1))
    chunk = (by_budget // sublane_mult) * sublane_mult
    if chunk == 0:
        chunk = sublane_mult              # minimum lowerable aligned chunk
    chunk = min(chunk, n_rows)
    if force_two_chunks and chunk >= n_rows and n_rows > sublane_mult:
        half = (n_rows + 1) // 2
        half = ((half + sublane_mult - 1) // sublane_mult) * sublane_mult
        if 0 < half < n_rows:
            chunk = half
    return chunk


def repeat_generator(audio_feat: jax.Array, query_num: int) -> jax.Array:
    """Pallas implementation of RepeatGenerator.forward.

    audio_feat: [B, T, C]
    returns:    [B, query_num * T, C]  (== audio_feat.repeat(1, query_num, 1))
    """
    B, T, C = audio_feat.shape
    TC = T * C
    dtype = audio_feat.dtype
    itemsize = jnp.dtype(dtype).itemsize

    # ---- lane-density guard: group `g` repeats per output row so the
    # flattened last dim (row_len) is a multiple of 128 -> full-lane stores.
    g = 128 // math.gcd(TC, 128)
    if g > 1 and query_num % g != 0:
        g = 1  # keep correctness; stores on the ragged tail will be masked
    row_len = g * TC
    n_rows = query_num // g

    # Lane-dense input slab [B, 1, row_len]. The reshape is contiguous (free);
    # the g-fold tile, when needed, is a tiny wrapper-side op (B*row_len elems).
    x_flat = audio_feat.reshape(B, 1, TC)
    if g > 1:
        x_flat = jnp.tile(x_flat, (1, 1, g))

    sublane_mult = _sublane_multiple(dtype)
    budget = _vmem_block_budget_bytes()
    force_two = (B == 1) and _chip_has_multiple_tensorcores()
    q_chunk = _pick_row_chunk(n_rows, row_len * itemsize, sublane_mult,
                              budget, force_two)
    n_q_chunks = pl.cdiv(n_rows, q_chunk)

    # Pure-bandwidth op: tell XLA's scheduler so it can overlap neighbors.
    cost = pl.CostEstimate(
        flops=0,
        transcendentals=0,
        bytes_accessed=B * TC * itemsize * (1 + query_num),
    )

    out_flat = pl.pallas_call(
        _repeat_kernel,
        out_shape=jax.ShapeDtypeStruct((B, n_rows, row_len), dtype),
        grid=(B, n_q_chunks),
        in_specs=[
            # Same input slab for every q chunk of batch b (stays resident).
            pl.BlockSpec((1, 1, row_len), lambda b, q: (b, 0, 0)),
        ],
        out_specs=pl.BlockSpec((1, q_chunk, row_len), lambda b, q: (b, q, 0)),
        compiler_params=pltpu.CompilerParams(
            dimension_semantics=("parallel", "parallel"),
            vmem_limit_bytes=32 * _MiB,
        ),
        cost_estimate=cost,
    )(x_flat)

    # Contiguous reshape back to the PyTorch output layout (no data movement).
    return out_flat.reshape(B, query_num * T, C)


if __name__ == "__main__":
    key = jax.random.PRNGKey(0)

    # Primary case: small shapes consistent with the module ([B, T, C] audio).
    B, T, C, query_num = 2, 8, 32, 4
    audio_feat = jax.random.normal(key, (B, T, C), dtype=jnp.float32)
    out = jax.block_until_ready(repeat_generator(audio_feat, query_num))
    ref = jnp.tile(audio_feat, (1, query_num, 1))
    assert out.shape == (B, query_num * T, C), out.shape
    assert jnp.array_equal(out, ref), "mismatch vs reference tile (case 1)"

    # B == 1 with a query count that forces a partial trailing q block on the
    # chunked/megacore-split path.
    k1, k2 = jax.random.split(key)
    a2 = jax.random.normal(k1, (1, 8, 32), dtype=jnp.float32)
    o2 = jax.block_until_ready(repeat_generator(a2, 20))
    assert jnp.array_equal(o2, jnp.tile(a2, (1, 20, 1))), "mismatch (case 2)"

    # Non-128-aligned T*C (grouped rows) with a 2-byte dtype (sublane mult 16).
    a3 = jax.random.normal(k2, (1, 5, 24), dtype=jnp.float32).astype(jnp.bfloat16)
    o3 = jax.block_until_ready(repeat_generator(a3, 16))
    assert jnp.array_equal(o3, jnp.tile(a3, (1, 16, 1))), "mismatch (case 3)"

    print("KERNEL_OK")
</pallas_src>

<mosaic_0001>
module attributes {stable_mosaic.version = 11 : i64} {
  func.func @_repeat_kernel(%arg0: i32, %arg1: i32, %arg2: memref<1x1x256xf32, #tpu.memory_space<vmem>>, %arg3: memref<1x4x256xf32, #tpu.memory_space<vmem>>) attributes {dimension_semantics = [#tpu.dimension_semantics<parallel>, #tpu.dimension_semantics<parallel>], iteration_bounds = array<i64: 2, 1>, scalar_prefetch = 0 : i64, scratch_operands = 0 : i64, tpu.core_type = #tpu.core_type<tc>, window_params = [{transform_indices = @transform_0, window_bounds = array<i64: 1, 1, 256>}, {transform_indices = @transform_1, window_bounds = array<i64: 1, 4, 256>}]} {
    %c0 = arith.constant 0 : index
    %c0_0 = arith.constant 0 : index
    %c0_1 = arith.constant 0 : index
    %0 = vector.load %arg2[%c0, %c0_0, %c0_1] : memref<1x1x256xf32, #tpu.memory_space<vmem>>, vector<1x1x256xf32>
    %1 = vector.shape_cast %0 : vector<1x1x256xf32> to vector<1x1x256xf32>
    %2 = vector.broadcast %1 : vector<1x1x256xf32> to vector<1x4x256xf32>
    %c0_2 = arith.constant 0 : index
    %c0_3 = arith.constant 0 : index
    %c0_4 = arith.constant 0 : index
    %3 = vector.load %arg3[%c0_2, %c0_3, %c0_4] : memref<1x4x256xf32, #tpu.memory_space<vmem>>, vector<1x4x256xf32>
    tpu.vector_store %arg3[%c0_2, %c0_3, %c0_4], %2 {strides = array<i32>} : memref<1x4x256xf32, #tpu.memory_space<vmem>>, vector<1x4x256xf32>,
    return
  }
  func.func @transform_0(%arg0: i32, %arg1: i32) -> (i32, i32, i32) {
    %c0_i32 = arith.constant 0 : i32
    %c0_i32_0 = arith.constant 0 : i32
    %c0_i32_1 = arith.constant 0 : i32
    return %arg0, %c0_i32, %c0_i32_0 : i32, i32, i32
  }
  func.func @transform_1(%arg0: i32, %arg1: i32) -> (i32, i32, i32) {
    %c0_i32 = arith.constant 0 : i32
    %c0_i32_0 = arith.constant 0 : i32
    return %arg0, %arg1, %c0_i32 : i32, i32, i32
  }
}

</mosaic_0001>

<bundles_post_ra>
// kernel: tpu_custom_call.1
= control target key start
LH: loop header
LB: loop body
LE: loop exit
PB: predicated region body
PF: predicated region fallthrough
CT: control target
= control target key end

     0   :  { %6 = vsyncpa [#allocation3], 0  ;;  %s579_s0 = inlined_call_operand.hbm [shape: f32[2,1,256], index: 0, kind: input, shape index: {}]   ;;  %s580_s1 = inlined_call_operand.hbm [shape: f32[2,4,256], index: 1, kind: output, shape index: {}]  }
   0x1   :  { %8 = vsyncpa [#allocation3 + $0x1], 0 }
   0x2   :  { %9 = vsyncpa [#allocation4], 0 }
   0x3   :  { %11 = vsyncpa [#allocation4 + $0x1], 0  ;;  %s458_s6 = smov 0   ;;  %s460_s7 = smov 0  }
   0x4   :  { %s462_s8 = smov 0   ;;  %s464_s9 = smov 0  }
   0x5   :  { %s466_s10 = smov 0   ;;  %s468_s11 = smov 0  }
   0x6 LB: > { %s257_s12 = sadd.s32 4294967295, %s446_s11   ;;  %s258_s13 = sadd.s32 4294967294, %s446_s11   ;;  %s446_s11 = sphi %s468_s11, %s17_s11   ;;  %s442_s10 = sphi %s466_s10, %s589_s10   ;;  %s438_s9 = sphi %s464_s9, %s588_s9   ;;  %s434_s8 = sphi %s462_s8, %s587_s8   ;;  %s430_s7 = sphi %s460_s7, %s586_s7   ;;  %s426_s6 = sphi %s458_s6, %s585_s6  }
   0x7   : > { %s29_s14 = sadd.s32 1, %s442_s10  ;;  %s36_s15 = sadd.s32 1, %s434_s8 }
   0x8   : > { %p31_p0 = scmp.ge.s32.totalorder %s29_s14, 2  ;;  %p43_p1 = scmp.ne.s32.totalorder %s434_s8, %s430_s7 }
   0x9   : > { %p44_p2 = scmp.eq.s32.totalorder %s446_s11, 0  ;;  %p49_p3 = scmp.ne.s32.totalorder %s430_s7, %s426_s6 }
   0xa   : > { %s591_s14 = smov (%p31_p0, %s29_s14), 0  ;;  %p50_p5 = scmp.eq.s32.totalorder %s257_s12, 0 }
   0xb   : > { %p499_p4 = por %p44_p2, %p43_p1  ;;  %s33_s17 = ssub.s32 %s442_s10, %s591_s14 }
   0xc   : > { %p75_p6 = scmp.eq.s32.totalorder %s257_s12, 1  ;;  %p34_p7 = scmp.eq.s32.totalorder %s33_s17, 0 }
   0xd   : > { %p505_p8 = por %p50_p5, %p49_p3  ;;  %p81_p10 = scmp.eq.s32.totalorder %s258_s13, 1 }
   0xe   : > { %p509_p9 = por %p75_p6, %p43_p1  ;;  %p260_p12 = scmp.ge.s32.totalorder %s446_s11, 2 }
   0xf   : > { %s514_s20 = scalar_select %p34_p7, %s434_s8, %s36_s15  }
  0x10   : > { %p516_p11 = por %p81_p10, %p49_p3  ;;  %p284_p13 = scmp.lt.s32.totalorder %s446_s11, 2 }
  0x11   : > { %s101_s22 = sand.u32 1, %s434_s8   ;;  %s262_s24 = sshll.u32 %s442_s10, 1 }
  0x12   : > { %s261_s23 = sshll.u32 %s101_s22, 1  ;;  %s109_s27 = scalar_lea.hbm %s579_s0, %s262_s24 }
  0x13   : > { %s105_s28 = scalar_lea.vmem [#allocation2], %s261_s23  ;;  %s111_s30 = sshll.u32 %s109_s27, 4  ;;  %s112_s30 = int_to_ptr.hbm [resolvable:$true] %s111_s30 }
  0x14   : > { %s113_s29 = sshll.u32 %s105_s28, 4  ;;  %p277_p0 = pnand %p284_p13, %p499_p4  ;;  %s114_s29 = int_to_ptr.vmem [resolvable:$true] %s113_s29 }
  0x15   : > { %p263_p1 = scmp.ge.s32.totalorder %s446_s11, 1  ;;  %p118_p2 = scmp.lt.s32.totalorder %s446_s11, 3 }
  0x16   : > { %s102_s2 = scalar_lea.sflag [#allocation3], %s101_s22 }
  0x17   : > { %279 = dma.hbm_to_vmem [thread:$0]  (!%p277_p0), %s112_s30, 32, %s114_s29, %s102_s2  }
  0x18   : > { %p119_p3 = pnand %p263_p1, %p118_p2 }
  0x19   : > { %s532_s3 = sand.u32 (!%p119_p3), 1, %s430_s7  }
  0x1a   : > { %122 = sbr.rel (%p119_p3) target bundleno = 47 (0x2f), region = 24  ;;  %s264_s4 = sshll.u32 (!%p119_p3), %s532_s3, 1 }
  0x1b   : > { %s125_s5 = scalar_lea.sflag (!%p119_p3), [#allocation3], %s532_s3  ;;  %s128_s12 = scalar_lea.vmem (!%p119_p3), [#allocation2], %s264_s4 }
  0x1f   : > { %417 = dma.done.wait (%p505_p8), %s125_s5, 32  }
  0x20   : > { %419 = vsyncadd (%p505_p8), %s125_s5, 4294967264  ;;  %s265_s13 = sshll.u32 %s532_s3, 3  ;;  %s271_s15 = sshll.u32 %s438_s9, 3  ;;  %v148_v0 = vld [vmem:[%s128_s12] sm:$0x3]  ;;  %vm153_vm0 = vcmask 1043456  }
  0x21   : > { %s171_s22 = scalar_lea.hbm %s580_s1, %s271_s15  ;;  %v150_v1 = vperm.slane %v148_v0, 0  ;;  %v151_v2 = vperm.slane %v148_v0, 1  ;;  %s147_s23 = scalar_lea.vmem [#allocation5], %s265_s13 }
  0x22   : > { %s173_s24 = sshll.u32 %s147_s23, 4  ;;  %s175_s25 = sshll.u32 %s171_s22, 4  ;;  %s174_s24 = int_to_ptr.vmem [resolvable:$true] %s173_s24  ;;  %s176_s25 = int_to_ptr.hbm [resolvable:$true] %s175_s25 }
  0x23   : > { %v152_v3 = vrot.slane %v151_v2, 4  ;;  %s158_s18 = scalar_lea.sflag [#allocation4], %s532_s3  ;;  %s378_s26 = sshra.s32 %s176_s25, 4  ;;  %s379_s26 = int_to_ptr.hbm [resolvable:$true] %s378_s26 }
  0x24   : > { %s380_s9 = scalar_lea.hbm %s379_s26, 8  ;;  %s384_s29 = scalar_lea.hbm %s580_s1, 16 }
  0x25   : > { %v154_v4 = vsel %vm153_vm0, %v150_v1, %v152_v3  ;;  %p381_p4 = scmp.ne.s32.totalorder %s379_s26, %s380_s9  ;;  %p385_p7 = scmp.lt.s32.totalorder %s379_s26, %s580_s1 }
  0x26   : > { %156 = vst [vmem:[%s147_s23] sm:$0xff] %v154_v4  ;;  %p386_p8 = scmp.lt.s32.totalorder %s384_s29, %s380_s9 }
  0x27   : > { %p382_p5 = pnand %p381_p4, %p509_p9 }
  0x28   : > { %p387_p10 = por %p386_p8, %p385_p7 }
  0x29   : > { %p383_p6 = pneg %p382_p5 }
  0x2b   : > { %p388_p13 = pnand %p387_p10, %p383_p6 }
  0x2d   : > { %391 = shalt.err (!%p388_p13)
}
  0x2e   : > { %274 = dma.vmem_to_hbm [thread:$0]  (%p509_p9), %s174_s24, 128, %s176_s25, %s158_s18  }
  0x2f PF: > { %s187_s3 = sand.u32 1, %s426_s6   ;;  %p281_p0 = pnand %p260_p12, %p516_p11 }
  0x30   : > { %s188_s4 = scalar_lea.sflag [#allocation4], %s187_s3 }
  0x31   : > { %p282_p1 = pneg %p281_p0 }
  0x33   : > { %421 = dma.done.wait (%p282_p1), %s188_s4, 128  }
  0x34   : > { %423 = vsyncadd (%p282_p1), %s188_s4, 4294967168  ;;  %s17_s11 = sadd.s32 1, %s446_s11   ;;  %s585_s6 = smov %s430_s7 }
  0x35   : > { %p14_p2 = scmp.ge.s32.totalorder %s17_s11, 4   ;;  %s586_s7 = smov %s434_s8 }
  0x36   : > { %s587_s8 = smov %s514_s20  ;;  %s588_s9 = smov %s442_s10 }
  0x37   : > { %s589_s10 = smov %s591_s14  ;;  %16 = sbr.rel (!%p14_p2) target bundleno = 6 (0x6), region = 69 }
  0x3c   :  { %194 = vsyncpa [#allocation3], 1 }
  0x3d   :  { %196 = vsyncpa [#allocation3 + $0x1], 1 }
  0x3e   :  { %197 = vsyncpa [#allocation4], 1 }
  0x3f   :  { %199 = vsyncpa [#allocation4 + $0x1], 1 }

</bundles_post_ra>
